<compile_context>
chip_gen: v5e
topology: v5e:2x2
jax: 0.10.0
libtpu: 0.0.40
codegen_flags: <defaults>
</compile_context>

<pallas_src>
import functools

import jax
import jax.numpy as jnp
import numpy as np
from jax import lax
from jax.experimental import pallas as pl
from jax.experimental.pallas import tpu as pltpu


def _cdiv(a, b):
    return -(-a // b)


def _round_up(a, b):
    return _cdiv(a, b) * b


def _vmem_budget_bytes():
    """~75% of this generation's VMEM (v5e/v6e: 128 MiB, v7x: 64 MiB/TC)."""
    try:
        cap = int(pltpu.get_tpu_info().vmem_capacity_bytes)
    except Exception:
        cap = 64 * 1024 * 1024  # conservative (v7x per-TC) when not on a TPU
    return (cap * 3) // 4


def _batch_tile_cap(L, Cp, Hp, budget_bytes, fuse_taps):
    """Largest batch tile whose per-grid-step VMEM footprint fits the budget."""
    # Per-layer weight blocks (f32), double-buffered by the pipeline.
    weight_bytes = 2 * 4 * (3 * Cp * Hp + Hp * Cp)
    # Per flattened activation row (one (1, Cp) slice of the (M, Cp) view):
    #   input block x2 (double buffer) + output block x2 + f32 scratch acc
    io_row = 4 * Cp * 5
    #   live per-layer temps: x, h, h[l-1], h[l+1] (Cp lanes) + t (Hp lanes)
    tmp_row = 4 * (4 * Cp + Hp)
    if fuse_taps:
        tmp_row += 4 * 3 * Cp  # the concatenated [h[l-1], h[l], h[l+1]]
    row_bytes = io_row + tmp_row
    avail = budget_bytes - weight_bytes
    return int(max(1, avail // (row_bytes * L)))


def _residual_stack_kernel(x_ref, w1_ref, w2_ref, o_ref, acc_ref, *, fuse_taps):
    """One (batch-tile, residual-layer) pair per grid step.

    x_ref  : (Bt, L, Cp)     input block (f32), channels-last, lane padded
    w1_ref : (1, 3, Cp, Hp)  this layer's 3-tap conv weights, taps ordered
                             [l-1, l, l+1] (torch kernel index 0, 1, 2)
    w2_ref : (1, Hp, Cp)     this layer's 1x1 conv weights
    o_ref  : (Bt, L, Cp)     output block (written at the last layer only)
    acc_ref: (Bt*L, Cp)      f32 activation carried across the layer grid axis
    """
    layer = pl.program_id(1)
    num_layers = pl.num_programs(1)
    Bt, L, Cp = x_ref.shape
    Hp = w2_ref.shape[1]
    M = Bt * L

    @pl.when(layer == 0)
    def _():
        acc_ref[...] = x_ref[...].reshape(M, Cp).astype(jnp.float32)

    x = acc_ref[...]

    # Per-sequence position of every flattened row.  (M, 1) masks broadcast
    # along lanes inside the selects (no (M, Cp) mask materialization).
    pos = lax.broadcasted_iota(jnp.int32, (M, 1), 0) % L
    not_first = pos != 0
    not_last = pos != (L - 1)

    h = jnp.maximum(x, 0.0)                                        # ReLU
    # h[l-1] / h[l+1] via XLU sublane rolls; rows that correspond to the conv
    # zero padding (and cross-batch wraparound) are zeroed by the masks.
    hm = jnp.where(not_first, pltpu.roll(h, 1, 0), 0.0)
    hp = jnp.where(not_last, pltpu.roll(h, M - 1, 0), 0.0)

    w1 = w1_ref[0]                                                 # (3, Cp, Hp)
    if fuse_taps:
        # Single MXU pass with K = 3*Cp (better K utilization when Cp == 128).
        hcat = jnp.concatenate([hm, h, hp], axis=-1)
        t = jnp.dot(hcat, w1.reshape(3 * Cp, Hp),
                    preferred_element_type=jnp.float32)
    else:
        # Three accumulating dots; avoids materializing the (M, 3*Cp) concat.
        t = jnp.dot(hm, w1[0], preferred_element_type=jnp.float32)
        t = t + jnp.dot(h, w1[1], preferred_element_type=jnp.float32)
        t = t + jnp.dot(hp, w1[2], preferred_element_type=jnp.float32)
    t = jnp.maximum(t, 0.0)                                        # ReLU

    # 1x1 conv + residual (f32), carried to the next layer grid step.
    acc_ref[...] = x + jnp.dot(t, w2_ref[0],
                               preferred_element_type=jnp.float32)

    @pl.when(layer == num_layers - 1)
    def _():
        o_ref[...] = jnp.maximum(acc_ref[...], 0.0).reshape(
            Bt, L, Cp).astype(o_ref.dtype)


def residual_stack_nlc(x_blc, w1_kio, w2_io):
    """Channels-last fast path (no wrapper transposes).

    x_blc : (B, L, C) f32   activations, channels-last
    w1_kio: (NL, 3, C, H)   conv1 weights, torch (O, I, K) -> (K, I, O) per layer
    w2_io : (NL, H, C)      conv2 weights, torch (O, I, 1) -> (I, O) per layer
    Returns (B, L, C) f32.
    """
    B, L, C = x_blc.shape
    num_layers, _, _, H = w1_kio.shape
    Cp = _round_up(C, 128)
    Hp = _round_up(H, 128)
    fuse_taps = Cp <= 128

    # Lane-pad channel dims; weights stay f32.
    # TODO(synk): on real hardware, bf16 matmul operands would roughly double
    # MXU throughput; kept f32 because bf16 x bf16 -> f32 dots are unsupported
    # by the CPU/interpret DotThunk used for verification.
    xp = jnp.pad(x_blc, ((0, 0), (0, 0), (0, Cp - C))) if Cp != C else x_blc
    w1p = jnp.pad(w1_kio, ((0, 0), (0, 0), (0, Cp - C), (0, Hp - H)))
    w1p = w1p.astype(jnp.float32)
    w2p = jnp.pad(w2_io, ((0, 0), (0, Hp - H), (0, Cp - C))).astype(jnp.float32)

    # Generation-aware VMEM budget and batch-tile sizing.
    budget = _vmem_budget_bytes()
    bt_cap = _batch_tile_cap(L, Cp, Hp, budget, fuse_taps)
    bt = max(1, min(B, bt_cap))
    grid_b = _cdiv(B, bt)
    if grid_b == 1 and B >= 2:
        grid_b = 2            # give both v7x TensorCores a block
    elif grid_b > 1 and grid_b % 2 == 1:
        grid_b += 1           # balanced work across the two v7x cores
    bt = _cdiv(B, grid_b)
    b_pad = grid_b * bt
    if b_pad != B:
        xp = jnp.pad(xp, ((0, b_pad - B), (0, 0), (0, 0)))

    kernel = functools.partial(_residual_stack_kernel, fuse_taps=fuse_taps)
    out_blc = pl.pallas_call(
        kernel,
        out_shape=jax.ShapeDtypeStruct((b_pad, L, Cp), x_blc.dtype),
        grid_spec=pltpu.PrefetchScalarGridSpec(
            num_scalar_prefetch=0,
            grid=(grid_b, num_layers),
            in_specs=[
                pl.BlockSpec((bt, L, Cp), lambda b, l: (b, 0, 0)),
                pl.BlockSpec((1, 3, Cp, Hp), lambda b, l: (l, 0, 0, 0)),
                pl.BlockSpec((1, Hp, Cp), lambda b, l: (l, 0, 0)),
            ],
            out_specs=pl.BlockSpec((bt, L, Cp), lambda b, l: (b, 0, 0)),
            scratch_shapes=[pltpu.VMEM((bt * L, Cp), jnp.float32)],
        ),
        compiler_params=pltpu.CompilerParams(
            dimension_semantics=("parallel", "arbitrary"),
            vmem_limit_bytes=int(budget)),
        # TODO(synk): for very long L, additionally tile L; with the per-layer
        # grid axis each layer pass only needs a 1-row halo (not num_layers
        # rows) and the activation would be carried in HBM between layers.
    )(xp, w1p, w2p)

    return out_blc[:B, :, :C]


def residual_stack(x_ncl, w1_kio, w2_io):
    """PyTorch-layout entry point. x_ncl: (B, C, L) f32 -> (B, C, L) f32."""
    # TODO(synk): keep the surrounding TOTEM encoder channels-last and call
    # residual_stack_nlc directly -- these two transposes are full extra HBM
    # passes over the activation.
    x_blc = jnp.transpose(x_ncl, (0, 2, 1))
    out_blc = residual_stack_nlc(x_blc, w1_kio, w2_io)
    return jnp.transpose(out_blc, (0, 2, 1))


def residual_stack_ref(x_ncl, w1, w2):
    """Pure-JAX f32 reference matching the PyTorch forward semantics (NCL)."""
    num_layers = w1.shape[0]
    L = x_ncl.shape[2]
    x = x_ncl.astype(jnp.float32)
    for i in range(num_layers):
        h = jax.nn.relu(x)
        hpad = jnp.pad(h, ((0, 0), (0, 0), (1, 1)))   # zero pad along length
        t = 0.0
        for k in range(3):
            # torch conv1d: out[:,o,l] = sum_{c,k} W[o,c,k] * x_pad[:,c,l+k]
            t = t + jnp.einsum("bcl,ch->bhl", hpad[:, :, k:k + L], w1[i, k],
                               precision=lax.Precision.HIGHEST)
        t = jax.nn.relu(t)
        x = x + jnp.einsum("bhl,hc->bcl", t, w2[i],
                           precision=lax.Precision.HIGHEST)
    return jax.nn.relu(x)


if __name__ == "__main__":
    # Small, forward-consistent shapes (the residual add requires
    # in_channels == num_hiddens, as in the PyTorch usage).
    B = 2
    num_hiddens = in_channels = 32
    L = 16
    num_residual_hiddens = 8
    num_residual_layers = 2

    key = jax.random.PRNGKey(0)
    kx, kw1, kw2 = jax.random.split(key, 3)

    x = jax.random.normal(kx, (B, in_channels, L), dtype=jnp.float32)
    # Synthetic weights with the Conv1d shapes, stored as (tap, in, out) /
    # (in, out), i.e. torch (O, I, K) -> (K, I, O) and (O, I) -> (I, O).
    w1 = 0.1 * jax.random.normal(
        kw1, (num_residual_layers, 3, in_channels, num_residual_hiddens),
        dtype=jnp.float32)
    w2 = 0.1 * jax.random.normal(
        kw2, (num_residual_layers, num_residual_hiddens, num_hiddens),
        dtype=jnp.float32)

    out = jax.block_until_ready(residual_stack(x, w1, w2))

    ref = residual_stack_ref(x, w1, w2)
    np.testing.assert_allclose(np.asarray(out), np.asarray(ref),
                               rtol=5e-3, atol=5e-3)
    print("KERNEL_OK")
</pallas_src>

<mosaic_0001>
module attributes {stable_mosaic.version = 11 : i64} {
  func.func @_residual_stack_kernel(%arg0: i32, %arg1: i32, %arg2: memref<1x16x128xf32, #tpu.memory_space<vmem>>, %arg3: memref<1x3x128x128xf32, #tpu.memory_space<vmem>>, %arg4: memref<1x128x128xf32, #tpu.memory_space<vmem>>, %arg5: memref<1x16x128xf32, #tpu.memory_space<vmem>>, %arg6: memref<16x128xf32, #tpu.memory_space<vmem>>) attributes {dimension_semantics = [#tpu.dimension_semantics<parallel>, #tpu.dimension_semantics<arbitrary>], iteration_bounds = array<i64: 2, 2>, scalar_prefetch = 0 : i64, scratch_operands = 1 : i64, tpu.core_type = #tpu.core_type<tc>, window_params = [{transform_indices = @transform_0, window_bounds = array<i64: 1, 16, 128>}, {transform_indices = @transform_1, window_bounds = array<i64: 1, 3, 128, 128>}, {transform_indices = @transform_2, window_bounds = array<i64: 1, 128, 128>}, {transform_indices = @transform_3, window_bounds = array<i64: 1, 16, 128>}]} {
    %c0_i32 = arith.constant 0 : i32
    %0 = arith.cmpi eq, %arg1, %c0_i32 : i32
    %1 = arith.extui %0 : i1 to i32
    %c0_i32_0 = arith.constant 0 : i32
    %2 = arith.cmpi ne, %1, %c0_i32_0 : i32
    scf.if %2 {
      %c0_25 = arith.constant 0 : index
      %c0_26 = arith.constant 0 : index
      %c0_27 = arith.constant 0 : index
      %52 = vector.load %arg2[%c0_25, %c0_26, %c0_27] : memref<1x16x128xf32, #tpu.memory_space<vmem>>, vector<1x16x128xf32>
      %53 = vector.shape_cast %52 : vector<1x16x128xf32> to vector<16x128xf32>
      %c0_28 = arith.constant 0 : index
      %c0_29 = arith.constant 0 : index
      %54 = vector.load %arg6[%c0_28, %c0_29] : memref<16x128xf32, #tpu.memory_space<vmem>>, vector<16x128xf32>
      tpu.vector_store %arg6[%c0_28, %c0_29], %53 {strides = array<i32>} : memref<16x128xf32, #tpu.memory_space<vmem>>, vector<16x128xf32>,
    } else {
    }
    %c0 = arith.constant 0 : index
    %c0_1 = arith.constant 0 : index
    %3 = vector.load %arg6[%c0, %c0_1] : memref<16x128xf32, #tpu.memory_space<vmem>>, vector<16x128xf32>
    %4 = tpu.iota {dimensions = array<i32: 0>} : vector<16x1xi32>
    %c16_i32 = arith.constant 16 : i32
    %c0_i32_2 = arith.constant 0 : i32
    %5 = arith.cmpi eq, %c16_i32, %c0_i32_2 : i32
    %c1_i32 = arith.constant 1 : i32
    %6 = arith.select %5, %c1_i32, %c16_i32 : i32
    %7 = vector.broadcast %6 : i32 to vector<16x1xi32>
    %8 = arith.remsi %4, %7 : vector<16x1xi32>
    %c0_i32_3 = arith.constant 0 : i32
    %9 = vector.broadcast %c0_i32_3 : i32 to vector<16x1xi32>
    %10 = arith.cmpi ne, %8, %9 : vector<16x1xi32>
    %c0_i32_4 = arith.constant 0 : i32
    %11 = vector.broadcast %c0_i32_4 : i32 to vector<16x1xi32>
    %12 = arith.cmpi slt, %8, %11 : vector<16x1xi32>
    %c0_i32_5 = arith.constant 0 : i32
    %13 = arith.cmpi slt, %6, %c0_i32_5 : i32
    %14 = vector.broadcast %13 : i1 to vector<16x1xi1>
    %15 = vector.broadcast %14 : vector<16x1xi1> to vector<16x1xi1>
    %16 = arith.xori %12, %15 : vector<16x1xi1>
    %17 = arith.andi %16, %10 : vector<16x1xi1>
    %18 = vector.broadcast %6 : i32 to vector<16x1xi32>
    %19 = arith.addi %8, %18 : vector<16x1xi32>
    %20 = arith.select %17, %19, %8 : vector<16x1xi1>, vector<16x1xi32>
    %c0_i32_6 = arith.constant 0 : i32
    %21 = vector.broadcast %c0_i32_6 : i32 to vector<16x1xi32>
    %22 = arith.cmpi ne, %20, %21 : vector<16x1xi32>
    %c15_i32 = arith.constant 15 : i32
    %23 = vector.broadcast %c15_i32 : i32 to vector<16x1xi32>
    %24 = arith.cmpi ne, %20, %23 : vector<16x1xi32>
    %cst = arith.constant 0.000000e+00 : f32
    %25 = vector.broadcast %cst : f32 to vector<16x128xf32>
    %26 = arith.maximumf %3, %25 : vector<16x128xf32>
    %c1_i32_7 = arith.constant 1 : i32
    %27 = tpu.dynamic_rotate %26 by %c1_i32_7 dim 0 : vector<16x128xf32>, i32 -> vector<16x128xf32>
    %cst_8 = arith.constant 0.000000e+00 : f32
    %28 = vector.shape_cast %22 : vector<16x1xi1> to vector<16x1xi1>
    %29 = vector.broadcast %28 : vector<16x1xi1> to vector<16x128xi1>
    %30 = vector.broadcast %cst_8 : f32 to vector<16x128xf32>
    %31 = arith.select %29, %27, %30 : vector<16x128xi1>, vector<16x128xf32>
    %c15_i32_9 = arith.constant 15 : i32
    %32 = tpu.dynamic_rotate %26 by %c15_i32_9 dim 0 : vector<16x128xf32>, i32 -> vector<16x128xf32>
    %cst_10 = arith.constant 0.000000e+00 : f32
    %33 = vector.shape_cast %24 : vector<16x1xi1> to vector<16x1xi1>
    %34 = vector.broadcast %33 : vector<16x1xi1> to vector<16x128xi1>
    %35 = vector.broadcast %cst_10 : f32 to vector<16x128xf32>
    %36 = arith.select %34, %32, %35 : vector<16x128xi1>, vector<16x128xf32>
    %c0_11 = arith.constant 0 : index
    %c0_12 = arith.constant 0 : index
    %c0_13 = arith.constant 0 : index
    %c0_14 = arith.constant 0 : index
    %37 = vector.load %arg3[%c0_11, %c0_12, %c0_13, %c0_14] : memref<1x3x128x128xf32, #tpu.memory_space<vmem>>, vector<1x3x128x128xf32>
    %38 = vector.shape_cast %37 : vector<1x3x128x128xf32> to vector<3x128x128xf32>
    %39 = tpu.concatenate %31, %26, %36 in 1 : vector<16x128xf32>, vector<16x128xf32>, vector<16x128xf32> -> vector<16x384xf32>
    %40 = vector.shape_cast %38 : vector<3x128x128xf32> to vector<384x128xf32>
    %cst_15 = arith.constant dense<0.000000e+00> : vector<16x128xf32>
    %41 = tpu.matmul %39, %40, %cst_15 {dimension_numbers = #tpu.dot_dimension_numbers<[1], [0], [0], [1], [0, 0, 1, 1], [], []>} : vector<16x384xf32>, vector<384x128xf32>, vector<16x128xf32> -> vector<16x128xf32>
    %cst_16 = arith.constant 0.000000e+00 : f32
    %42 = vector.broadcast %cst_16 : f32 to vector<16x128xf32>
    %43 = arith.maximumf %41, %42 : vector<16x128xf32>
    %c0_17 = arith.constant 0 : index
    %c0_18 = arith.constant 0 : index
    %c0_19 = arith.constant 0 : index
    %44 = vector.load %arg4[%c0_17, %c0_18, %c0_19] : memref<1x128x128xf32, #tpu.memory_space<vmem>>, vector<1x128x128xf32>
    %45 = vector.shape_cast %44 : vector<1x128x128xf32> to vector<128x128xf32>
    %cst_20 = arith.constant dense<0.000000e+00> : vector<16x128xf32>
    %46 = tpu.matmul %43, %45, %cst_20 {dimension_numbers = #tpu.dot_dimension_numbers<[1], [0], [0], [1], [0, 0, 1, 1], [], []>} : vector<16x128xf32>, vector<128x128xf32>, vector<16x128xf32> -> vector<16x128xf32>
    %47 = arith.addf %3, %46 : vector<16x128xf32>
    %c0_21 = arith.constant 0 : index
    %c0_22 = arith.constant 0 : index
    %48 = vector.load %arg6[%c0_21, %c0_22] : memref<16x128xf32, #tpu.memory_space<vmem>>, vector<16x128xf32>
    tpu.vector_store %arg6[%c0_21, %c0_22], %47 {strides = array<i32>} : memref<16x128xf32, #tpu.memory_space<vmem>>, vector<16x128xf32>,
    %c1_i32_23 = arith.constant 1 : i32
    %49 = arith.cmpi eq, %arg1, %c1_i32_23 : i32
    %50 = arith.extui %49 : i1 to i32
    %c0_i32_24 = arith.constant 0 : i32
    %51 = arith.cmpi ne, %50, %c0_i32_24 : i32
    scf.if %51 {
      %c0_25 = arith.constant 0 : index
      %c0_26 = arith.constant 0 : index
      %52 = vector.load %arg6[%c0_25, %c0_26] : memref<16x128xf32, #tpu.memory_space<vmem>>, vector<16x128xf32>
      %cst_27 = arith.constant 0.000000e+00 : f32
      %53 = vector.broadcast %cst_27 : f32 to vector<16x128xf32>
      %54 = arith.maximumf %52, %53 : vector<16x128xf32>
      %55 = vector.shape_cast %54 : vector<16x128xf32> to vector<1x16x128xf32>
      %c0_28 = arith.constant 0 : index
      %c0_29 = arith.constant 0 : index
      %c0_30 = arith.constant 0 : index
      %56 = vector.load %arg5[%c0_28, %c0_29, %c0_30] : memref<1x16x128xf32, #tpu.memory_space<vmem>>, vector<1x16x128xf32>
      tpu.vector_store %arg5[%c0_28, %c0_29, %c0_30], %55 {strides = array<i32>} : memref<1x16x128xf32, #tpu.memory_space<vmem>>, vector<1x16x128xf32>,
    } else {
    }
    return
  }
  func.func @transform_0(%arg0: i32, %arg1: i32) -> (i32, i32, i32) {
    %c0_i32 = arith.constant 0 : i32
    %c0_i32_0 = arith.constant 0 : i32
    %c0_i32_1 = arith.constant 0 : i32
    return %arg0, %c0_i32, %c0_i32_0 : i32, i32, i32
  }
  func.func @transform_1(%arg0: i32, %arg1: i32) -> (i32, i32, i32, i32) {
    %c0_i32 = arith.constant 0 : i32
    %c0_i32_0 = arith.constant 0 : i32
    %c0_i32_1 = arith.constant 0 : i32
    %c0_i32_2 = arith.constant 0 : i32
    return %arg1, %c0_i32, %c0_i32_0, %c0_i32_1 : i32, i32, i32, i32
  }
  func.func @transform_2(%arg0: i32, %arg1: i32) -> (i32, i32, i32) {
    %c0_i32 = arith.constant 0 : i32
    %c0_i32_0 = arith.constant 0 : i32
    %c0_i32_1 = arith.constant 0 : i32
    return %arg1, %c0_i32, %c0_i32_0 : i32, i32, i32
  }
  func.func @transform_3(%arg0: i32, %arg1: i32) -> (i32, i32, i32) {
    %c0_i32 = arith.constant 0 : i32
    %c0_i32_0 = arith.constant 0 : i32
    %c0_i32_1 = arith.constant 0 : i32
    return %arg0, %c0_i32, %c0_i32_0 : i32, i32, i32
  }
}

</mosaic_0001>

<bundles_post_ra>
// kernel: tpu_custom_call.1
= control target key start
LH: loop header
LB: loop body
LE: loop exit
PB: predicated region body
PF: predicated region fallthrough
CT: control target
= control target key end

     0   :  { %s1392_s0 = inlined_call_operand.hbm [shape: f32[2,16,128], index: 0, kind: input, shape index: {}]   ;;  %s1393_s1 = inlined_call_operand.hbm [shape: f32[2,3,128,128], index: 1, kind: input, shape index: {}]   ;;  %s1394_s2 = inlined_call_operand.hbm [shape: f32[2,128,128], index: 2, kind: input, shape index: {}]   ;;  %s1395_s3 = inlined_call_operand.hbm [shape: f32[2,16,128], index: 3, kind: output, shape index: {}]  }
   0x1   :  { %1410 = sst [smem:[#allocation24_spill]] %s1393_s1 }
   0x2   :  { %1411 = sst [smem:[#allocation25_spill]] %s1395_s3 }
   0x3   :  { %8 = vsyncpa [#allocation4], 0 }
   0x4   :  { %10 = vsyncpa [#allocation4 + $0x1], 0 }
   0x5   :  { %11 = vsyncpa [#allocation7], 0 }
   0x6   :  { %13 = vsyncpa [#allocation7 + $0x1], 0 }
   0x7   :  { %14 = vsyncpa [#allocation5], 0 }
   0x8   :  { %16 = vsyncpa [#allocation5 + $0x1], 0  ;;  %s1052_s12 = smov 0   ;;  %s1054_s13 = smov 0  }
   0x9   :  { %s1056_s14 = smov 0   ;;  %s1058_s15 = smov 0  }
   0xa   :  { %s1060_s16 = smov 0   ;;  %s1062_s17 = smov 0  }
   0xb   :  { %s1064_s18 = smov 0   ;;  %s1066_s19 = smov 0  }
   0xc   :  { %s1068_s20 = smov 0   ;;  %s1070_s21 = smov 0  }
   0xd   :  { %s1072_s22 = smov 0  }
   0xe LB: > { %1412 = sst [smem:[#allocation13_spill]] %s994_s14  ;;  %s1106_s23 = sadd.s32 4294967295, %s1026_s22   ;;  %s1026_s22 = sphi %s1072_s22, %s22_s22   ;;  %s1022_s21 = sphi %s1070_s21, %s1445_s21   ;;  %s1018_s20 = sphi %s1068_s20, %s1451_s20   ;;  %s1014_s19 = sphi %s1066_s19, %s1443_s19   ;;  %s1010_s18 = sphi %s1064_s18, %s1450_s18   ;;  %s1006_s17 = sphi %s1062_s17, %s1442_s17   ;;  %s1002_s16 = sphi %s1060_s16, %s1449_s16   ;;  %s998_s15 = sphi %s1058_s15, %s1448_s15   ;;  %s994_s14 = sphi %s1056_s14, %s1440_s14   ;;  %s990_s13 = sphi %s1054_s13, %s1447_s13   ;;  %s986_s12 = sphi %s1052_s12, %s1446_s12  }
   0xf   : > { %1413 = sst [smem:[#allocation14_spill]] %s998_s15  ;;  %s31_s24 = sadd.s32 1, %s1018_s20 }
  0x10   : > { %1414 = sst [smem:[#allocation15_spill]] %s1006_s17  ;;  %p1109_p0 = scmp.ge.s32.totalorder %s31_s24, 2 }
  0x11   : > { %1415 = sst [smem:[#allocation16_spill]] %s1014_s19  ;;  %p49_p1 = scmp.eq.s32.totalorder %s1026_s22, 0 }
  0x12   : > { %1416 = sst [smem:[#allocation17_spill]] %s1022_s21  ;;  %p55_p2 = scmp.eq.s32.totalorder %s1106_s23, 0 }
  0x13   : > { %s67_s26 = sadd.s32 1, %s994_s14  ;;  %s1453_s24 = smov (%p1109_p0, %s31_s24), 0 }
  0x14   : > { %1418 = sst [smem:[#allocation18_spill]] %s1453_s24  ;;  %p74_p3 = scmp.ne.s32.totalorder %s994_s14, %s990_s13 }
  0x15   : > { %p80_p4 = scmp.ne.s32.totalorder %s990_s13, %s986_s12  ;;  %s64_s27 = ssub.s32 %s1018_s20, %s1453_s24 }
  0x16   : > { %p65_p5 = scmp.eq.s32.totalorder %s64_s27, 0  ;;  %p76_p6 = por %p74_p3, %p49_p1 }
  0x17   : > { %p1129_p7 = por %p80_p4, %p55_p2  ;;  %p716_p8 = scmp.lt.s32.totalorder %s1026_s22, 4 }
  0x18   : > { %s1135_s29 = scalar_select %p65_p5, %s994_s14, %s67_s26  }
  0x19   : > { %s178_s30 = sand.u32 1, %s1026_s22   ;;  %s180_s4 = sand.u32 1, %s994_s14  }
  0x1a   : > { %1420 = sst [smem:[#allocation19_spill]] %s1135_s29  ;;  %s691_s5 = smul.u32 384, %s180_s4 }
  0x1b   : > { %s692_s6 = smul.u32 384, %s1018_s20  ;;  %p1142_p9 = pnand %p716_p8, %p76_p6 }
  0x1c   : > { %s1146_s8 = sshll.u32 %s180_s4, 7  ;;  %s1422_s1 = sld [smem:[#allocation24_spill]] }
  0x1d   : > { %s182_s12 = scalar_lea.vmem [#allocation6], %s691_s5  ;;  %s1151_s4 = scalar_lea.sflag [#allocation7], %s178_s30 }
  0x1e   : > { %s190_s26 = sshll.u32 %s182_s12, 4  ;;  %s1397_s24 = smov 128   ;;  %s191_s26 = int_to_ptr.vmem [resolvable:$true] %s190_s26 }
  0x1f   : > { %s1399_s9 = smov 8   ;;  %p675_p10 = scmp.ge.s32.totalorder %s1026_s22, 1 }
  0x20   : > { %p220_p11 = scmp.lt.s32.totalorder %s1026_s22, 5  ;;  %s34_s30 = sadd.s32 1, %s1022_s21 }
  0x21   : > { %s1455_s30 = smov (!%p1109_p0, %s34_s30), %s1022_s21  ;;  %s41_s10 = sadd.s32 1, %s1006_s17 }
  0x22   : > { %s187_s11 = scalar_lea.hbm %s1422_s1, %s692_s6  ;;  %p1161_p12 = pnand %p675_p10, %p220_p11 }
  0x23   : > { %s188_s27 = sshll.u32 %s187_s11, 4  ;;  %s665_s6 = sadd.s32 4294967294, %s1026_s22   ;;  %s189_s27 = int_to_ptr.hbm [resolvable:$true] %s188_s27 }
  0x24   : > { %708 = dma.hbm_to_vmem [thread:$0]  (!%p1142_p9), %s189_s27, 6144, %s191_s26, %s1151_s4, %s1397_s24, %s1397_s24, %s1399_s9  }
  0x25   : > { %p48_p13 = scmp.ne.s32.totalorder %s1006_s17, %s1002_s16  ;;  %p36_p3 = scmp.ge.s32.totalorder %s1455_s30, 2 }
  0x26   : > { %p54_p4 = scmp.ne.s32.totalorder %s1002_s16, %s998_s15  ;;  %p130_p6 = scmp.eq.s32.totalorder %s1106_s23, 3 }
  0x27   : > { %p1177_p5 = por %p49_p1, %p48_p13  ;;  %s1457_s30 = smov (%p36_p3, %s1455_s30), 0 }
  0x28   : > { %1425 = sst [smem:[#allocation20_spill]] %s1457_s30  ;;  %p1186_p10 = por %p55_p2, %p54_p4 }
  0x29   : > { %p1190_p0 = por %p130_p6, %p48_p13  ;;  %s38_s26 = ssub.s32 %s1022_s21, %s1457_s30 }
  0x2a   : > { %p136_p1 = scmp.eq.s32.totalorder %s665_s6, 3  ;;  %p39_p11 = scmp.eq.s32.totalorder %s38_s26, 0 }
  0x2b   : > { %s1427_s25 = scalar_select %p1190_p0, 1, 0 }
  0x2c   : > { %s156_s27 = sand.u32 1, %s1006_s17   ;;  %p1197_p3 = por %p136_p1, %p54_p4 }
  0x2d   : > { %1428 = sst [smem:[#allocation21_spill]] %s1427_s25  ;;  %s668_s1 = sshll.u32 %s156_s27, 4 }
  0x2e   : > { %s1429_s24 = scalar_select %p1197_p3, 1, 0 }
  0x2f   : > { %s1202_s9 = scalar_select %p39_p11, %s1006_s17, %s41_s10  }
  0x30   : > { %1430 = sst [smem:[#allocation22_spill]] %s1429_s24  ;;  %s688_s29 = sshll.u32 %s1022_s21, 4 }
  0x31   : > { %1431 = sst [smem:[#allocation23_spill]] %s1202_s9  ;;  %s165_s3 = scalar_lea.hbm %s1392_s0, %s688_s29 }
  0x32   : > { %s166_s25 = sshll.u32 %s165_s3, 4  ;;  %s160_s30 = scalar_lea.vmem [#allocation3], %s668_s1  ;;  %s167_s25 = int_to_ptr.hbm [resolvable:$true] %s166_s25 }
  0x33   : > { %s168_s6 = sshll.u32 %s160_s30, 4  ;;  %p703_p2 = pnand %p716_p8, %p1177_p5  ;;  %s169_s6 = int_to_ptr.vmem [resolvable:$true] %s168_s6 }
  0x34   : > { %s689_s26 = sshll.u32 %s1018_s20, 7  ;;  %s204_s21 = scalar_lea.vmem [#allocation8], %s1146_s8 }
  0x35   : > { %s209_s9 = scalar_lea.hbm %s1394_s2, %s689_s26  ;;  %s212_s17 = sshll.u32 %s204_s21, 4  ;;  %s213_s17 = int_to_ptr.vmem [resolvable:$true] %s212_s17 }
  0x36   : > { %s210_s19 = sshll.u32 %s209_s9, 4  ;;  %s157_s14 = scalar_lea.sflag [#allocation4], %s156_s27  ;;  %s211_s19 = int_to_ptr.hbm [resolvable:$true] %s210_s19 }
  0x37   : > { %s1432_s15 = smov 8   ;;  %s1433_s29 = smov 128  }
  0x38   : > { %705 = dma.hbm_to_vmem [thread:$0]  (!%p703_p2), %s167_s25, 256, %s169_s6, %s157_s14, %s1433_s29, %s1433_s29, %s1432_s15  }
  0x39   : > { %711 = dma.hbm_to_vmem [thread:$0]  (!%p1142_p9), %s211_s19, 2048, %s213_s17, %s1151_s4, %s1433_s29, %s1433_s29, %s1432_s15  }
  0x3a   : > { %224 = sbr.rel (%p1161_p12) target bundleno = 423 (0x1a7), region = 32  ;;  %s1229_s1 = sand.u32 (!%p1161_p12), 1, %s1002_s16  }
  0x3b   : > { %s676_s3 = sshll.u32 (!%p1161_p12), %s1229_s1, 4  ;;  %s227_s21 = scalar_lea.sflag (!%p1161_p12), [#allocation4], %s1229_s1 }
  0x3c   : > { %s230_s24 = scalar_lea.vmem (!%p1161_p12), [#allocation3], %s676_s3 }
  0x3f   : > { %973 = dma.done.wait (%p1186_p10), %s227_s21, 256  }
  0x40   : > { %975 = vsyncadd (%p1186_p10), %s227_s21, 4294967040  ;;  %s236_s17 = sand.u32 1, %s1106_s23   ;;  %s238_s19 = sand.u32 1, %s990_s13  }
  0x41   : > { %s693_s7 = smul.u32 384, %s238_s19  ;;  %s237_s8 = scalar_lea.sflag [#allocation7], %s236_s17 }
  0x43   : > { %s1239_s4 = scalar_lea.vmem [#allocation6], %s693_s7 }
  0x44   : > { %977 = dma.done.wait (%p1129_p7), %s237_s8, 8192  }
  0x45   : > { %979 = vsyncadd (%p1129_p7), %s237_s8, 4294959104  ;;  %s677_s9 = sshll.u32 %s238_s19, 7  ;;  %s1247_s30 = scalar_lea.vmem [#allocation9], %s676_s3 }
  0x46   : > { %s1245_s5 = scalar_lea.vmem [#allocation8], %s677_s9  ;;  %p679_p8 = scmp.ne.s32.totalorder %s1010_s18, 0 }
  0x48   : > { %287 = sbr.rel (%p679_p8) target bundleno = 80 (0x50), region = 48 }
  0x4d   : > { %v288_v0 = vld [vmem:[%s230_s24] sm:$0xff]  ;;  %v289_v1 = vld [vmem:[%s230_s24 + $0x8] sm:$0xff] }
  0x4e   : > { %290 = vst [vmem:[#allocation2] sm:$0xff] %v288_v0 }
  0x4f   : > { %291 = vst [vmem:[#allocation2 + $0x8] sm:$0xff] %v289_v1 }
  0x50 PF: > { %v396_v2 = vld [vmem:[%s1239_s4 + $0x178] sm:$0xff]  ;;  %v395_v3 = vld [vmem:[%s1239_s4 + $0x170] sm:$0xff]  ;;  %v394_v7 = vld [vmem:[%s1239_s4 + $0x168] sm:$0xff]  ;;  %v294_v37 = vlaneseq  ;;  %p682_p7 = scmp.ne.s32.totalorder %s1010_s18, 1 }
  0x51   : > { %v364_v4 = vld [vmem:[%s1239_s4 + $0x78] sm:$0xff]  ;;  %443 = vmatpush.msra.mxu2 %v396_v2  ;;  %v363_v6 = vld [vmem:[%s1239_s4 + $0x70] sm:$0xff]  ;;  %v362_v9 = vld [vmem:[%s1239_s4 + $0x68] sm:$0xff] }
  0x52   : > { %397 = vmatpush.msra.mxu0 %v364_v4  ;;  %v380_v5 = vld [vmem:[%s1239_s4 + $0xf8] sm:$0xff]  ;;  %v379_v8 = vld [vmem:[%s1239_s4 + $0xf0] sm:$0xff]  ;;  %v378_v10 = vld [vmem:[%s1239_s4 + $0xe8] sm:$0xff]  ;;  %v295_v48 = vshrl.u32 %v294_v37, 7 }
  0x53   : > { %420 = vmatpush.msra.mxu1 %v380_v5  ;;  %444 = vmatpush.msra.mxu2 %v395_v3  ;;  %v393_v11 = vld [vmem:[%s1239_s4 + $0x160] sm:$0xff]  ;;  %v392_v14 = vld [vmem:[%s1239_s4 + $0x158] sm:$0xff]  ;;  %v391_v17 = vld [vmem:[%s1239_s4 + $0x150] sm:$0xff] }
  0x54   : > { %398 = vmatpush.msra.mxu0 %v363_v6  ;;  %v361_v12 = vld [vmem:[%s1239_s4 + $0x60] sm:$0xff]  ;;  %v360_v15 = vld [vmem:[%s1239_s4 + $0x58] sm:$0xff]  ;;  %v359_v18 = vld [vmem:[%s1239_s4 + $0x50] sm:$0xff]  ;;  %vm340_vm0 = vcmp.lt.s32.totalorder %v295_v48, 7  ;;  %v301_v59 = vand.u32 15, %v295_v48  ;;  %vm329_vm1 = vcmp.lt.s32.totalorder %v295_v48, 1 }
  0x55   : > { %421 = vmatpush.msra.mxu1 %v379_v8  ;;  %445 = vmatpush.msra.mxu2 %v394_v7  ;;  %v377_v13 = vld [vmem:[%s1239_s4 + $0xe0] sm:$0xff]  ;;  %v376_v16 = vld [vmem:[%s1239_s4 + $0xd8] sm:$0xff]  ;;  %v375_v19 = vld [vmem:[%s1239_s4 + $0xd0] sm:$0xff]  ;;  %v296_v4 = vadd.s32 8, %v295_v48 }
  0x56   : > { %399 = vmatpush.msra.mxu0 %v362_v9  ;;  %v390_v20 = vld [vmem:[%s1239_s4 + $0x148] sm:$0xff]  ;;  %v389_v23 = vld [vmem:[%s1239_s4 + $0x140] sm:$0xff]  ;;  %v388_v26 = vld [vmem:[%s1239_s4 + $0x138] sm:$0xff]  ;;  %vm321_vm2 = vcmp.ne.s32.totalorder %v301_v59, 0 }
  0x57   : > { %422 = vmatpush.msra.mxu1 %v378_v10  ;;  %446 = vmatpush.msra.mxu2 %v393_v11  ;;  %v358_v21 = vld [vmem:[%s1239_s4 + $0x48] sm:$0xff]  ;;  %v357_v24 = vld [vmem:[%s1239_s4 + $0x40] sm:$0xff]  ;;  %v356_v27 = vld [vmem:[%s1239_s4 + $0x38] sm:$0xff]  ;;  %v308_v7 = vand.u32 15, %v296_v4 }
  0x58   : > { %400 = vmatpush.msra.mxu0 %v361_v12  ;;  %v374_v22 = vld [vmem:[%s1239_s4 + $0xc8] sm:$0xff]  ;;  %v373_v25 = vld [vmem:[%s1239_s4 + $0xc0] sm:$0xff]  ;;  %v372_v28 = vld [vmem:[%s1239_s4 + $0xb8] sm:$0xff] }
  0x59   : > { %423 = vmatpush.msra.mxu1 %v377_v13  ;;  %447 = vmatpush.msra.mxu2 %v392_v14  ;;  %v387_v29 = vld [vmem:[%s1239_s4 + $0x130] sm:$0xff]  ;;  %v483_v31 = vld [vmem:[%s1245_s5 + $0x78] sm:$0xff]  ;;  %v386_v32 = vld [vmem:[%s1239_s4 + $0x128] sm:$0xff]  ;;  %vm324_vm3 = vcmp.ne.s32.totalorder %v308_v7, 15 }
  0x5a   : > { %401 = vmatpush.msra.mxu0 %v360_v15  ;;  %v355_v30 = vld [vmem:[%s1239_s4 + $0x30] sm:$0xff]  ;;  %v354_v34 = vld [vmem:[%s1239_s4 + $0x28] sm:$0xff]  ;;  %v1285_v36 = vld [vmem:[#allocation2 + $0x8] sm:$0xff]  ;;  %484 = vmatpush.msra.mxu3 %v483_v31 }
  0x5b   : > { %424 = vmatpush.msra.mxu1 %v376_v16  ;;  %448 = vmatpush.msra.mxu2 %v391_v17  ;;  %v371_v33 = vld [vmem:[%s1239_s4 + $0xb0] sm:$0xff]  ;;  %v370_v38 = vld [vmem:[%s1239_s4 + $0xa8] sm:$0xff]  ;;  %v385_v40 = vld [vmem:[%s1239_s4 + $0x120] sm:$0xff]  ;;  %v1296_v44 = vmax.f32 %v1285_v36, 0.0 }
  0x5c   : > { %402 = vmatpush.msra.mxu0 %v359_v18  ;;  %v1283_v35 = vld [vmem:[#allocation2] sm:$0xff]  ;;  %v353_v41 = vld [vmem:[%s1239_s4 + $0x20] sm:$0xff]  ;;  %v481_v45 = vld [vmem:[%s1245_s5 + $0x68] sm:$0xff] }
  0x5d   : > { %425 = vmatpush.msra.mxu1 %v375_v19  ;;  %449 = vmatpush.msra.mxu2 %v390_v20  ;;  %v482_v39 = vld [vmem:[%s1245_s5 + $0x70] sm:$0xff]  ;;  %v369_v42 = vld [vmem:[%s1239_s4 + $0xa0] sm:$0xff]  ;;  %v1293_v43 = vmax.f32 %v1283_v35, 0.0  ;;  %v384_v46 = vld [vmem:[%s1239_s4 + $0x118] sm:$0xff]  ;;  %v339_v55 = vrot.slane %v1296_v44, 1  ;;  %v328_v61 = vrot.slane %v1296_v44, 7 }
  0x5e   : > { %403 = vmatpush.msra.mxu0 %v358_v21  ;;  %v352_v47 = vld [vmem:[%s1239_s4 + $0x18] sm:$0xff]  ;;  %485 = vmatpush.msra.mxu3 %v482_v39  ;;  %v480_v50 = vld [vmem:[%s1245_s5 + $0x60] sm:$0xff]  ;;  %v383_v51 = vld [vmem:[%s1239_s4 + $0x110] sm:$0xff] }
  0x5f   : > { %426 = vmatpush.msra.mxu1 %v374_v22  ;;  %450 = vmatpush.msra.mxu2 %v389_v23  ;;  %v368_v49 = vld [vmem:[%s1239_s4 + $0x98] sm:$0xff]  ;;  %v351_v52 = vld [vmem:[%s1239_s4 + $0x10] sm:$0xff]  ;;  %v338_v54 = vrot.slane %v1293_v43, 1  ;;  %v382_v57 = vld [vmem:[%s1239_s4 + $0x108] sm:$0xff]  ;;  %v327_v60 = vrot.slane %v1293_v43, 7 }
  0x60   : > { %404 = vmatpush.msra.mxu0 %v357_v24  ;;  %486 = vmatpush.msra.mxu3 %v481_v45  ;;  %v367_v53 = vld [vmem:[%s1239_s4 + $0x90] sm:$0xff]  ;;  %v479_v56 = vld [vmem:[%s1245_s5 + $0x58] sm:$0xff]  ;;  %v350_v58 = vld [vmem:[%s1239_s4 + $0x8] sm:$0xff] }
  0x61   : > { %427 = vmatpush.msra.mxu1 %v373_v25  ;;  %451 = vmatpush.msra.mxu2 %v388_v26  ;;  %v366_v62 = vld [vmem:[%s1239_s4 + $0x88] sm:$0xff]  ;;  %v478_v63 = vld [vmem:[%s1245_s5 + $0x50] sm:$0xff]  ;;  %v381_v0 = vld [vmem:[%s1239_s4 + $0x100] sm:$0xff]  ;;  %v341_v2 = vsel %vm340_vm0, %v338_v54, %v339_v55  ;;  %v331_v5 = vsel %vm329_vm1, %v328_v61, %v327_v60  ;;  %v342_v10 = vsel %vm340_vm0, %v339_v55, %v338_v54 }
  0x62   : > { %405 = vmatpush.msra.mxu0 %v356_v27  ;;  %487 = vmatpush.msra.mxu3 %v480_v50  ;;  %v349_v1 = vld [vmem:[%s1239_s4] sm:$0xff]  ;;  %v477_v6 = vld [vmem:[%s1245_s5 + $0x48] sm:$0xff]  ;;  %v475_v9 = vld [vmem:[%s1245_s5 + $0x38] sm:$0xff]  ;;  %v330_v12 = vsel %vm329_vm1, %v327_v60, %v328_v61 }
  0x63   : > { %428 = vmatpush.msra.mxu1 %v372_v28  ;;  %452 = vmatpush.msra.mxu2 %v387_v29  ;;  %v365_v3 = vld [vmem:[%s1239_s4 + $0x80] sm:$0xff]  ;;  %v474_v11 = vld [vmem:[%s1245_s5 + $0x30] sm:$0xff]  ;;  %v473_v13 = vld [vmem:[%s1245_s5 + $0x28] sm:$0xff] }
  0x64   : > { %406 = vmatpush.msra.mxu0 %v355_v30  ;;  %488 = vmatpush.msra.mxu3 %v479_v56  ;;  %v476_v8 = vld [vmem:[%s1245_s5 + $0x40] sm:$0xff]  ;;  %v471_v15 = vld [vmem:[%s1245_s5 + $0x18] sm:$0xff]  ;;  %v470_v16 = vld [vmem:[%s1245_s5 + $0x10] sm:$0xff] }
  0x65   : > { %429 = vmatpush.msra.mxu1 %v371_v33  ;;  %453 = vmatpush.msra.mxu2 %v386_v32  ;;  %v472_v14 = vld [vmem:[%s1245_s5 + $0x20] sm:$0xff]  ;;  %v469_v17 = vld [vmem:[%s1245_s5 + $0x8] sm:$0xff] }
  0x66   : > { %407 = vmatpush.msra.mxu0 %v354_v34  ;;  %489 = vmatpush.msra.mxu3 %v478_v63  ;;  %v468_v18 = vld [vmem:[%s1245_s5] sm:$0xff] }
  0x67   : > { %430 = vmatpush.msra.mxu1 %v370_v38  ;;  %454 = vmatpush.msra.mxu2 %v385_v40 }
  0x68   : > { %408 = vmatpush.msra.mxu0 %v353_v41  ;;  %490 = vmatpush.msra.mxu3 %v477_v6 }
  0x69   : > { %431 = vmatpush.msra.mxu1 %v369_v42  ;;  %455 = vmatpush.msra.mxu2 %v384_v46 }
  0x6a   : > { %409 = vmatpush.msra.mxu0 %v352_v47  ;;  %491 = vmatpush.msra.mxu3 %v476_v8 }
  0x6b   : > { %432 = vmatpush.msra.mxu1 %v368_v49  ;;  %456 = vmatpush.msra.mxu2 %v383_v51 }
  0x6c   : > { %410 = vmatpush.msra.mxu0 %v351_v52  ;;  %492 = vmatpush.msra.mxu3 %v475_v9 }
  0x6d   : > { %433 = vmatpush.msra.mxu1 %v367_v53  ;;  %457 = vmatpush.msra.mxu2 %v382_v57 }
  0x6e   : > { %411 = vmatpush.msra.mxu0 %v350_v58  ;;  %493 = vmatpush.msra.mxu3 %v474_v11 }
  0x6f   : > { %434 = vmatpush.msra.mxu1 %v366_v62  ;;  %458 = vmatpush.msra.mxu2 %v381_v0 }
  0x70   : > { %412 = vmatpush.msra.mxu0 %v349_v1  ;;  %459 = vmatmul.f32.vlgmr.msra.gmra.mxu2 %v341_v2 }
  0x71   : > { %435 = vmatpush.msra.mxu1 %v365_v3  ;;  %680 = vmatmul.msk.f32.vlgmr.msra.gmra.mxu0 %vm321_vm2, %v331_v5 }
  0x72   : > { %436 = vmatmul.f32.vlgmr.msra.gmra.mxu1 %v1293_v43  ;;  %494 = vmatpush.msra.mxu3 %v473_v13 }
  0x74   : > { %495 = vmatpush.msra.mxu3 %v472_v14 }
  0x76   : > { %496 = vmatpush.msra.mxu3 %v471_v15 }
  0x78   : > { %681 = vmatmul.msk.f32.gmra.mxu2 %vm324_vm3, %v342_v10  ;;  %497 = vmatpush.msra.mxu3 %v470_v16 }
  0x79   : > { %416 = vmatmul.f32.gmra.mxu0 %v330_v12 }
  0x7a   : > { %439 = vmatmul.f32.gmra.mxu1 %v1296_v44  ;;  %498 = vmatpush.msra.mxu3 %v469_v17 }
  0x7c   : > { %499 = vmatpush.msra.mxu3 %v468_v18 }
  0xee   : > { %v414_v19 = vpop.f32.mrf.mxu0 }
  0xef   : > { %v437_v20 = vpop.f32.mrf.mxu1 }
  0xf0   : > { %v438_v21 = vadd.f32 %v437_v20, %v414_v19 }
  0xf3   : > { %v460_v22 = vpop.f32.mrf.mxu2 }
  0xf4   : > { %v461_v23 = vadd.f32 %v460_v22, %v438_v21 }
  0xf6   : > { %v466_v24 = vmax.f32 %v461_v23, 0.0  ;;  %v417_v25 = vpop.f32.mrf.mxu0 }
  0xf7   : > { %v440_v26 = vpop.f32.mrf.mxu1 }
  0xf8   : > { %500 = vmatmul.f32.vlgmr.msra.gmra.mxu3 %v466_v24  ;;  %v441_v27 = vadd.f32 %v440_v26, %v417_v25 }
  0xfb   : > { %v463_v28 = vpop.f32.mrf.mxu2 }
  0xfc   : > { %v464_v29 = vadd.f32 %v463_v28, %v441_v27 }
  0xfe   : > { %v467_v30 = vmax.f32 %v464_v29, 0.0 }
 0x100   : > { %503 = vmatmul.f32.gmra.mxu3 %v467_v30 }
 0x17b   : > { %v501_v31 = vpop.f32.mrf.mxu3 }
 0x17c   : > { %v507_v32 = vadd.f32 %v501_v31, %v1283_v35 }
 0x17e   : > { %509 = vst [vmem:[#allocation2] sm:$0xff] %v507_v32 }
 0x182   : > { %514 = sbr.rel (%p682_p7) target bundleno = 401 (0x191), region = 52 }
 0x183   : > { %v504_v33 = vpop.f32.mrf.mxu3 }
 0x184   : > { %v508_v34 = vadd.f32 %v504_v33, %v1285_v36 }
 0x186   : > { %510 = vst [vmem:[#allocation2 + $0x8] sm:$0xff] %v508_v34 }
 0x187   : > { %v515_v37 = vld [vmem:[#allocation2] sm:$0xff] }
 0x188   : > { %v517_v39 = vmax.f32 %v515_v37, 0.0 }
 0x18a   : > { %519 = vst [vmem:[%s1247_s30] sm:$0xff] %v517_v39 }
 0x18d   : > { %v516_v38 = vld [vmem:[#allocation2 + $0x8] sm:$0xff] }
 0x18e   : > { %v518_v40 = vmax.f32 %v516_v38, 0.0 }
 0x190   : > { %520 = vst [vmem:[%s1247_s30 + $0x8] sm:$0xff] %v518_v40 }
 0x191 PF: > { %s1434_s23 = sld [smem:[#allocation16_spill]]  ;;  %s534_s18 = sshll.u32 %s1247_s30, 4  ;;  %s535_s18 = int_to_ptr.vmem [resolvable:$true] %s534_s18 }
 0x192   : > { %s1436_s27 = sld [smem:[#allocation25_spill]]  ;;  %s522_s10 = scalar_lea.sflag [#allocation5], %s1229_s1 }
 0x197   : > { %s690_s11 = sshll.u32 %s1434_s23, 4 }
 0x198   : > { %s533_s6 = scalar_lea.hbm %s1436_s27, %s690_s11  ;;  %s920_s21 = scalar_lea.hbm %s1436_s27, 32 }
 0x199   : > { %s536_s26 = sshll.u32 %s533_s6, 4  ;;  %s537_s26 = int_to_ptr.hbm [resolvable:$true] %s536_s26 }
 0x19a   : > { %s914_s14 = sshra.s32 %s537_s26, 4  ;;  %s915_s14 = int_to_ptr.hbm [resolvable:$true] %s914_s14 }
 0x19b   : > { %s916_s15 = scalar_lea.hbm %s915_s14, 16  ;;  %p921_p4 = scmp.lt.s32.totalorder %s915_s14, %s1436_s27 }
 0x19c   : > { %p917_p9 = scmp.ne.s32.totalorder %s915_s14, %s916_s15  ;;  %p922_p5 = scmp.lt.s32.totalorder %s920_s21, %s916_s15 }
 0x19e   : > { %p918_p12 = pnand %p917_p9, %p1190_p0  ;;  %p923_p6 = por %p922_p5, %p921_p4 }
 0x1a0   : > { %p919_p13 = pneg %p918_p12 }
 0x1a2   : > { %p924_p10 = pnand %p923_p6, %p919_p13 }
 0x1a4   : > { %927 = shalt.err (!%p924_p10)
}
 0x1a5   : > { %s1030_s1 = smov 128   ;;  %s1031_s19 = smov 8  }
 0x1a6   : > { %700 = dma.vmem_to_hbm [thread:$0]  (%p1190_p0), %s535_s18, 256, %s537_s26, %s522_s10, %s1030_s1, %s1030_s1, %s1031_s19  }
 0x1a7 PF: > { %s1437_s7 = sld [smem:[#allocation14_spill]]  ;;  %p717_p1 = scmp.ge.s32.totalorder %s1026_s22, 2 }
 0x1a9   : > { %p713_p11 = pnand %p717_p1, %p1197_p3 }
 0x1ab   : > { %p714_p2 = pneg %p713_p11 }
 0x1ad   : > { %s551_s4 = sand.u32 1, %s1437_s7  }
 0x1ae   : > { %s552_s9 = scalar_lea.sflag [#allocation5], %s551_s4 }
 0x1af   : > { %981 = dma.done.wait (%p714_p2), %s552_s9, 256  }
 0x1b0   : > { %983 = vsyncadd (%p714_p2), %s552_s9, 4294967040  ;;  %s22_s22 = sadd.s32 1, %s1026_s22   ;;  %s1439_s5 = sld [smem:[#allocation13_spill]] }
 0x1b1   : > { %p19_p8 = scmp.ge.s32.totalorder %s22_s22, 6   ;;  %s1440_s14 = sld [smem:[#allocation19_spill]] }
 0x1b2   : > { %s1441_s30 = sld [smem:[#allocation15_spill]]  ;;  %s1446_s12 = smov %s990_s13 }
 0x1b3   : > { %s1442_s17 = sld [smem:[#allocation23_spill]]  ;;  %s1448_s15 = smov %s1002_s16 }
 0x1b4   : > { %s1443_s19 = sld [smem:[#allocation17_spill]]  ;;  %s1450_s18 = smov %s1018_s20 }
 0x1b5   : > { %s1444_s23 = sld [smem:[#allocation18_spill]] }
 0x1b6   : > { %s1445_s21 = sld [smem:[#allocation20_spill]]  ;;  %s1447_s13 = smov %s1439_s5 }
 0x1b7   :  { %21 = sbr.rel (!%p19_p8) target bundleno = 14 (0xe), region = 109 }
 0x1b8   : > { %s1449_s16 = smov %s1441_s30 }
 0x1bb   : > { %s1451_s20 = smov %s1444_s23 }
 0x1bc   :  { %558 = vsyncpa [#allocation4], 1 }
 0x1bd   :  { %560 = vsyncpa [#allocation4 + $0x1], 1 }
 0x1be   :  { %561 = vsyncpa [#allocation7], 1 }
 0x1bf   :  { %563 = vsyncpa [#allocation7 + $0x1], 1 }
 0x1c0   :  { %564 = vsyncpa [#allocation5], 1 }
 0x1c1   :  { %566 = vsyncpa [#allocation5 + $0x1], 1 }

</bundles_post_ra>
